<compile_context>
chip_gen: v7x
topology: tpu7x:2x2x1
jax: 0.10.0
libtpu: 0.0.40
codegen_flags: <defaults>
</compile_context>

<pallas_src>
import functools

import jax
import jax.numpy as jnp
from jax.experimental import pallas as pl
from jax.experimental.pallas import tpu as pltpu

LEAKY_SLOPE = 0.01  # torch.nn.LeakyReLU default
LANE = 128          # TPU lane width


def _round_up(n, m):
    return ((n + m - 1) // m) * m


def _vmem_capacity_bytes():
    """Physical VMEM of the current TPU generation (conservative fallback)."""
    try:
        return int(pltpu.get_tpu_info().vmem_capacity_bytes)
    except Exception:
        return 64 * 1024 * 1024  # v7x per-TC VMEM; safe lower bound everywhere


def _mlp_kernel(*refs, n_layers, last_act):
    """Fused MLP segment on one batch tile.

    refs = (x_ref, w0_ref, b0_ref, ..., w{n-1}_ref, b{n-1}_ref, o_ref).
    Intermediates stay in f32 vregs/VMEM; only the last layer's output is
    stored.  `last_act=True` applies LeakyReLU after the segment's last layer
    (used for non-final segments of a split network).
    """
    x_ref = refs[0]
    o_ref = refs[1 + 2 * n_layers]

    h = x_ref[...].astype(jnp.float32)
    for i in range(n_layers):  # unrolled at trace time
        w = refs[1 + 2 * i][...]
        b = refs[2 + 2 * i][...]
        # bf16 weights were pre-cast at init; only the small activation tile is
        # cast per layer.  Accumulation is always f32 on the MXU.
        lhs = h if w.dtype == jnp.float32 else h.astype(w.dtype)
        y = jnp.dot(lhs, w, preferred_element_type=jnp.float32)
        y = y + b.astype(jnp.float32)  # (1, Dout) broadcasts over the batch tile
        if i != n_layers - 1 or last_act:
            y = jnp.where(y >= 0.0, y, LEAKY_SLOPE * y)
        h = y
    o_ref[...] = h.astype(o_ref.dtype)


def _pick_batch_tile(B, tile_bytes_fn, budget, min_mult=8):
    """Largest batch tile that divides B and fits the VMEM budget."""
    for cand in (1024, 512, 256, 128, 64, 32, 16, 8):
        if cand < min_mult:
            continue
        if B >= cand and B % cand == 0 and tile_bytes_fn(cand) <= budget:
            return cand
    return B  # single tile covering the full batch (block == full array dim)


def mlp_segment_pallas(x, weights_t, biases, *, last_act, vmem_cap,
                       single_buffer_params):
    """One fused pallas_call over a contiguous run of layers.

    x: (B, Din0_pad) f32; weights_t[i]: (Din_i_pad, Dout_i_pad) (pre-transposed,
    lane-padded, possibly bf16); biases[i]: (1, Dout_i_pad) f32.
    """
    B, Din0 = x.shape
    n_layers = len(weights_t)
    Dout_last = int(weights_t[-1].shape[1])
    x_bytes = x.dtype.itemsize

    param_bytes = sum(int(w.size) * w.dtype.itemsize for w in weights_t)
    param_bytes += sum(int(b.size) * b.dtype.itemsize for b in biases)
    # Pallas double-buffers every input by default; single-buffered resident
    # params halve their VMEM footprint.
    param_vmem = param_bytes if single_buffer_params else 2 * param_bytes

    max_feat = max([Din0] + [int(w.shape[1]) for w in weights_t])

    def tile_bytes(tb):
        io = 2 * tb * Din0 * x_bytes + 2 * tb * Dout_last * x_bytes  # dbl-buffered x/out
        act = 3 * tb * max_feat * 4                                  # f32 working set
        return io + act

    budget = max(int(0.9 * vmem_cap) - param_vmem, 4 * 1024 * 1024)
    min_mult = 16 if any(w.dtype == jnp.bfloat16 for w in weights_t) else 8
    tb = _pick_batch_tile(B, tile_bytes, budget, min_mult=min_mult)
    grid = (pl.cdiv(B, tb),)

    # Batch-tiled activation/output; whole-array, grid-invariant weights/biases
    # (constant index_map => VMEM-resident across batch tiles).
    in_specs = [pl.BlockSpec((tb, Din0), lambda i: (i, 0))]
    wb_kwargs = {"pipeline_mode": pl.Buffered(1)} if single_buffer_params else {}
    for w in weights_t:
        din, dout = int(w.shape[0]), int(w.shape[1])
        in_specs.append(pl.BlockSpec((din, dout), lambda i: (0, 0), **wb_kwargs))
        in_specs.append(pl.BlockSpec((1, dout), lambda i: (0, 0), **wb_kwargs))
    out_specs = pl.BlockSpec((tb, Dout_last), lambda i: (i, 0))

    est_bytes = param_vmem + tile_bytes(tb)
    cp_kwargs = dict(dimension_semantics=("parallel",))
    # TODO(synk): on v7x, verify via the profiler that the batch grid shards
    # across both TensorCores; if one TC idles, switch to pltpu.CORE_PARALLEL
    # or pl.core_map over pltpu.create_tensorcore_mesh.
    if est_bytes > 16 * 1024 * 1024:
        cp_kwargs["vmem_limit_bytes"] = int(
            min(max(2 * est_bytes, 48 * 1024 * 1024), 0.9 * vmem_cap))

    flops = 2 * B * sum(int(w.shape[0]) * int(w.shape[1]) for w in weights_t)
    bytes_accessed = B * Din0 * x_bytes + param_bytes + B * Dout_last * x_bytes
    cost = pl.CostEstimate(flops=flops, transcendentals=0,
                           bytes_accessed=bytes_accessed)

    kernel = functools.partial(_mlp_kernel, n_layers=n_layers, last_act=last_act)

    flat_inputs = [x]
    for w, b in zip(weights_t, biases):
        flat_inputs += [w, b]

    return pl.pallas_call(
        kernel,
        out_shape=jax.ShapeDtypeStruct((B, Dout_last), x.dtype),
        grid_spec=pl.GridSpec(grid=grid, in_specs=in_specs, out_specs=out_specs),
        compiler_params=pltpu.CompilerParams(**cp_kwargs),
        cost_estimate=cost,
    )(*flat_inputs)


class NetworkPallas:
    """JAX/Pallas equivalent of the PyTorch `Network` MLP (fully fused)."""

    def __init__(self, dims_in, dims_out, dropout_rate=0.0, key=None,
                 use_bf16_matmul=False, single_buffer_weights=True):
        n_layers = len(dims_out)
        assert list(dims_out[:-1]) == list(dims_in[1:]), (
            "Dimension of subsequent layer not matching")
        assert dropout_rate == 0.0, "only dropout_rate=0.0 (identity) supported"
        # TODO(synk): dropout_rate > 0 would need pltpu.prng_seed /
        # pltpu.prng_random_bits masking inside the fused kernel.
        if key is None:
            key = jax.random.PRNGKey(0)

        self.n_layers = n_layers
        self._din0_pad = _round_up(dims_in[0], LANE)
        self._dout_last = dims_out[-1]
        self._vmem_cap = _vmem_capacity_bytes()
        self._use_bf16 = use_bf16_matmul

        weights_ref, weights_t, biases = [], [], []
        for d_in, d_out in zip(dims_in, dims_out):
            key, kw, kb = jax.random.split(key, 3)
            # torch.nn.Linear default init: U(-1/sqrt(in), 1/sqrt(in))
            bound = 1.0 / (d_in ** 0.5)
            w = jax.random.uniform(kw, (d_out, d_in), jnp.float32, -bound, bound)
            b = jax.random.uniform(kb, (d_out,), jnp.float32, -bound, bound)
            # Pre-transpose to (in, out) and zero-pad feature dims to 128
            # multiples (lane-dense loads/stores; math unchanged).
            din_p, dout_p = _round_up(d_in, LANE), _round_up(d_out, LANE)
            w_t = jnp.zeros((din_p, dout_p), jnp.float32).at[:d_in, :d_out].set(w.T)
            b_p = jnp.zeros((1, dout_p), jnp.float32).at[:, :d_out].set(b)
            weights_ref.append(w_t)
            # Pre-cast weights once at init for the bf16 MXU path (no per-tile casts).
            weights_t.append(w_t.astype(jnp.bfloat16) if use_bf16_matmul else w_t)
            biases.append(b_p)

        self.weights_ref = weights_ref   # padded f32, for the pure-JAX reference
        self.weights_t = weights_t
        self.biases = biases
        self._params = (tuple(weights_t), tuple(biases))
        self._plan = self._plan_segments()
        self._sb_options = (True, False) if single_buffer_weights else (False,)
        self._forward = None

    def _plan_segments(self):
        """Split layers into fused pallas_call segments whose (single-buffered)
        params fit comfortably in VMEM (relevant on v7x's 64 MiB)."""
        budget = int(0.45 * self._vmem_cap)
        segs, cur, cur_bytes = [], [], 0
        for i, (w, b) in enumerate(zip(self.weights_t, self.biases)):
            nb = int(w.size) * w.dtype.itemsize + int(b.size) * b.dtype.itemsize
            if cur and cur_bytes + nb > budget:
                segs.append(cur)
                cur, cur_bytes = [], 0
            # TODO(synk): a single layer larger than the budget would need
            # output-feature tiling (extra grid axis); kept as its own segment.
            cur.append(i)
            cur_bytes += nb
        if cur:
            segs.append(cur)
        return segs

    def _build_forward(self, single_buffer_params):
        plan = self._plan
        din0_pad = self._din0_pad
        dout_last = self._dout_last
        vmem_cap = self._vmem_cap

        def fwd(x, params):
            weights_t, biases = params
            if x.shape[1] != din0_pad:
                x = jnp.pad(x, ((0, 0), (0, din0_pad - x.shape[1])))
            h = x
            for si, seg in enumerate(plan):
                h = mlp_segment_pallas(
                    h,
                    [weights_t[i] for i in seg],
                    [biases[i] for i in seg],
                    last_act=(si != len(plan) - 1),
                    vmem_cap=vmem_cap,
                    single_buffer_params=single_buffer_params)
            return h[:, :dout_last]

        return jax.jit(fwd)

    def __call__(self, x):
        if self._forward is None:
            err = None
            for sb in self._sb_options:
                fwd = self._build_forward(sb)
                try:
                    y = jax.block_until_ready(fwd(x, self._params))
                    self._forward = fwd
                    return y
                except Exception as e:
                    # pl.Buffered(1) unsupported or VMEM plan rejected -> fall
                    # back to the default double-buffered configuration.
                    err = e
            raise err
        return self._forward(x, self._params)


def _reference_forward(net: NetworkPallas, x):
    """Pure-JAX f32 reference (uses the same padded params; math identical)."""
    h = jnp.pad(x, ((0, 0), (0, net._din0_pad - x.shape[1])))
    for i, (w_t, b) in enumerate(zip(net.weights_ref, net.biases)):
        h = h @ w_t + b
        if i != net.n_layers - 1:
            h = jnp.where(h >= 0.0, h, LEAKY_SLOPE * h)
    return h[:, :net._dout_last]


if __name__ == "__main__":
    key = jax.random.PRNGKey(0)
    k_param, k_x = jax.random.split(key)

    # Small MLP consistent with the module contract: dims_out[:-1] == dims_in[1:]
    dims_in = [16, 32, 32]
    dims_out = [32, 32, 8]
    batch = 8

    net = NetworkPallas(dims_in, dims_out, dropout_rate=0.0, key=k_param)
    x = jax.random.normal(k_x, (batch, dims_in[0]), dtype=jnp.float32)

    y = jax.block_until_ready(net(x))
    y_ref = _reference_forward(net, x)

    assert y.shape == (batch, dims_out[-1])
    assert jnp.allclose(y, y_ref, atol=1e-5, rtol=1e-5)

    print("KERNEL_OK")
</pallas_src>

<mosaic_0001>
module attributes {stable_mosaic.version = 11 : i64} {
  func.func @_mlp_kernel(%arg0: i32, %arg1: memref<8x128xf32, #tpu.memory_space<vmem>>, %arg2: memref<128x128xf32, #tpu.memory_space<vmem>>, %arg3: memref<1x128xf32, #tpu.memory_space<vmem>>, %arg4: memref<128x128xf32, #tpu.memory_space<vmem>>, %arg5: memref<1x128xf32, #tpu.memory_space<vmem>>, %arg6: memref<128x128xf32, #tpu.memory_space<vmem>>, %arg7: memref<1x128xf32, #tpu.memory_space<vmem>>, %arg8: memref<8x128xf32, #tpu.memory_space<vmem>>) attributes {dimension_semantics = [#tpu.dimension_semantics<parallel>], iteration_bounds = array<i64: 1>, scalar_prefetch = 0 : i64, scratch_operands = 0 : i64, tpu.core_type = #tpu.core_type<tc>, window_params = [{transform_indices = @transform_0, window_bounds = array<i64: 8, 128>}, {pipeline_mode = #tpu.pipeline_mode<synchronous>, transform_indices = @transform_1, window_bounds = array<i64: 128, 128>}, {pipeline_mode = #tpu.pipeline_mode<synchronous>, transform_indices = @transform_2, window_bounds = array<i64: 1, 128>}, {pipeline_mode = #tpu.pipeline_mode<synchronous>, transform_indices = @transform_3, window_bounds = array<i64: 128, 128>}, {pipeline_mode = #tpu.pipeline_mode<synchronous>, transform_indices = @transform_4, window_bounds = array<i64: 1, 128>}, {pipeline_mode = #tpu.pipeline_mode<synchronous>, transform_indices = @transform_5, window_bounds = array<i64: 128, 128>}, {pipeline_mode = #tpu.pipeline_mode<synchronous>, transform_indices = @transform_6, window_bounds = array<i64: 1, 128>}, {transform_indices = @transform_7, window_bounds = array<i64: 8, 128>}]} {
    %c0 = arith.constant 0 : index
    %c0_0 = arith.constant 0 : index
    %0 = vector.load %arg1[%c0, %c0_0] : memref<8x128xf32, #tpu.memory_space<vmem>>, vector<8x128xf32>
    %c0_1 = arith.constant 0 : index
    %c0_2 = arith.constant 0 : index
    %1 = vector.load %arg2[%c0_1, %c0_2] : memref<128x128xf32, #tpu.memory_space<vmem>>, vector<128x128xf32>
    %c0_3 = arith.constant 0 : index
    %c0_4 = arith.constant 0 : index
    %2 = vector.load %arg3[%c0_3, %c0_4] : memref<1x128xf32, #tpu.memory_space<vmem>>, vector<1x128xf32>
    %cst = arith.constant dense<0.000000e+00> : vector<8x128xf32>
    %3 = tpu.matmul %0, %1, %cst {dimension_numbers = #tpu.dot_dimension_numbers<[1], [0], [0], [1], [0, 0, 1, 1], [], []>} : vector<8x128xf32>, vector<128x128xf32>, vector<8x128xf32> -> vector<8x128xf32>
    %4 = vector.broadcast %2 : vector<1x128xf32> to vector<8x128xf32>
    %5 = arith.addf %3, %4 : vector<8x128xf32>
    %cst_5 = arith.constant 0.000000e+00 : f32
    %6 = vector.broadcast %cst_5 : f32 to vector<8x128xf32>
    %7 = arith.cmpf oge, %5, %6 : vector<8x128xf32>
    %cst_6 = arith.constant 0.00999999977 : f32
    %8 = vector.broadcast %cst_6 : f32 to vector<8x128xf32>
    %9 = arith.mulf %8, %5 : vector<8x128xf32>
    %10 = arith.select %7, %5, %9 : vector<8x128xi1>, vector<8x128xf32>
    %c0_7 = arith.constant 0 : index
    %c0_8 = arith.constant 0 : index
    %11 = vector.load %arg4[%c0_7, %c0_8] : memref<128x128xf32, #tpu.memory_space<vmem>>, vector<128x128xf32>
    %c0_9 = arith.constant 0 : index
    %c0_10 = arith.constant 0 : index
    %12 = vector.load %arg5[%c0_9, %c0_10] : memref<1x128xf32, #tpu.memory_space<vmem>>, vector<1x128xf32>
    %cst_11 = arith.constant dense<0.000000e+00> : vector<8x128xf32>
    %13 = tpu.matmul %10, %11, %cst_11 {dimension_numbers = #tpu.dot_dimension_numbers<[1], [0], [0], [1], [0, 0, 1, 1], [], []>} : vector<8x128xf32>, vector<128x128xf32>, vector<8x128xf32> -> vector<8x128xf32>
    %14 = vector.broadcast %12 : vector<1x128xf32> to vector<8x128xf32>
    %15 = arith.addf %13, %14 : vector<8x128xf32>
    %cst_12 = arith.constant 0.000000e+00 : f32
    %16 = vector.broadcast %cst_12 : f32 to vector<8x128xf32>
    %17 = arith.cmpf oge, %15, %16 : vector<8x128xf32>
    %cst_13 = arith.constant 0.00999999977 : f32
    %18 = vector.broadcast %cst_13 : f32 to vector<8x128xf32>
    %19 = arith.mulf %18, %15 : vector<8x128xf32>
    %20 = arith.select %17, %15, %19 : vector<8x128xi1>, vector<8x128xf32>
    %c0_14 = arith.constant 0 : index
    %c0_15 = arith.constant 0 : index
    %21 = vector.load %arg6[%c0_14, %c0_15] : memref<128x128xf32, #tpu.memory_space<vmem>>, vector<128x128xf32>
    %c0_16 = arith.constant 0 : index
    %c0_17 = arith.constant 0 : index
    %22 = vector.load %arg7[%c0_16, %c0_17] : memref<1x128xf32, #tpu.memory_space<vmem>>, vector<1x128xf32>
    %cst_18 = arith.constant dense<0.000000e+00> : vector<8x128xf32>
    %23 = tpu.matmul %20, %21, %cst_18 {dimension_numbers = #tpu.dot_dimension_numbers<[1], [0], [0], [1], [0, 0, 1, 1], [], []>} : vector<8x128xf32>, vector<128x128xf32>, vector<8x128xf32> -> vector<8x128xf32>
    %24 = vector.broadcast %22 : vector<1x128xf32> to vector<8x128xf32>
    %25 = arith.addf %23, %24 : vector<8x128xf32>
    %c0_19 = arith.constant 0 : index
    %c0_20 = arith.constant 0 : index
    %26 = vector.load %arg8[%c0_19, %c0_20] : memref<8x128xf32, #tpu.memory_space<vmem>>, vector<8x128xf32>
    tpu.vector_store %arg8[%c0_19, %c0_20], %25 {strides = array<i32>} : memref<8x128xf32, #tpu.memory_space<vmem>>, vector<8x128xf32>,
    return
  }
  func.func @transform_0(%arg0: i32) -> (i32, i32) {
    %c0_i32 = arith.constant 0 : i32
    %c0_i32_0 = arith.constant 0 : i32
    return %arg0, %c0_i32 : i32, i32
  }
  func.func @transform_1(%arg0: i32) -> (i32, i32) {
    %c0_i32 = arith.constant 0 : i32
    %c0_i32_0 = arith.constant 0 : i32
    %c0_i32_1 = arith.constant 0 : i32
    return %c0_i32, %c0_i32_0 : i32, i32
  }
  func.func @transform_2(%arg0: i32) -> (i32, i32) {
    %c0_i32 = arith.constant 0 : i32
    %c0_i32_0 = arith.constant 0 : i32
    %c0_i32_1 = arith.constant 0 : i32
    return %c0_i32, %c0_i32_0 : i32, i32
  }
  func.func @transform_3(%arg0: i32) -> (i32, i32) {
    %c0_i32 = arith.constant 0 : i32
    %c0_i32_0 = arith.constant 0 : i32
    %c0_i32_1 = arith.constant 0 : i32
    return %c0_i32, %c0_i32_0 : i32, i32
  }
  func.func @transform_4(%arg0: i32) -> (i32, i32) {
    %c0_i32 = arith.constant 0 : i32
    %c0_i32_0 = arith.constant 0 : i32
    %c0_i32_1 = arith.constant 0 : i32
    return %c0_i32, %c0_i32_0 : i32, i32
  }
  func.func @transform_5(%arg0: i32) -> (i32, i32) {
    %c0_i32 = arith.constant 0 : i32
    %c0_i32_0 = arith.constant 0 : i32
    %c0_i32_1 = arith.constant 0 : i32
    return %c0_i32, %c0_i32_0 : i32, i32
  }
  func.func @transform_6(%arg0: i32) -> (i32, i32) {
    %c0_i32 = arith.constant 0 : i32
    %c0_i32_0 = arith.constant 0 : i32
    %c0_i32_1 = arith.constant 0 : i32
    return %c0_i32, %c0_i32_0 : i32, i32
  }
  func.func @transform_7(%arg0: i32) -> (i32, i32) {
    %c0_i32 = arith.constant 0 : i32
    %c0_i32_0 = arith.constant 0 : i32
    return %arg0, %c0_i32 : i32, i32
  }
}

module attributes {stable_mosaic.version = 11 : i64} {
  func.func @_mlp_kernel(%arg0: i32, %arg1: memref<8x128xf32, #tpu.memory_space<vmem>>, %arg2: memref<128x128xf32, #tpu.memory_space<vmem>>, %arg3: memref<1x128xf32, #tpu.memory_space<vmem>>, %arg4: memref<128x128xf32, #tpu.memory_space<vmem>>, %arg5: memref<1x128xf32, #tpu.memory_space<vmem>>, %arg6: memref<128x128xf32, #tpu.memory_space<vmem>>, %arg7: memref<1x128xf32, #tpu.memory_space<vmem>>, %arg8: memref<8x128xf32, #tpu.memory_space<vmem>>) attributes {dimension_semantics = [#tpu.dimension_semantics<parallel>], iteration_bounds = array<i64: 1>, scalar_prefetch = 0 : i64, scratch_operands = 0 : i64, tpu.core_type = #tpu.core_type<tc>, window_params = [{transform_indices = @transform_0, window_bounds = array<i64: 8, 128>}, {pipeline_mode = #tpu.pipeline_mode<synchronous>, transform_indices = @transform_1, window_bounds = array<i64: 128, 128>}, {pipeline_mode = #tpu.pipeline_mode<synchronous>, transform_indices = @transform_2, window_bounds = array<i64: 1, 128>}, {pipeline_mode = #tpu.pipeline_mode<synchronous>, transform_indices = @transform_3, window_bounds = array<i64: 128, 128>}, {pipeline_mode = #tpu.pipeline_mode<synchronous>, transform_indices = @transform_4, window_bounds = array<i64: 1, 128>}, {pipeline_mode = #tpu.pipeline_mode<synchronous>, transform_indices = @transform_5, window_bounds = array<i64: 128, 128>}, {pipeline_mode = #tpu.pipeline_mode<synchronous>, transform_indices = @transform_6, window_bounds = array<i64: 1, 128>}, {transform_indices = @transform_7, window_bounds = array<i64: 8, 128>}]} {
    %c0 = arith.constant 0 : index
    %c0_0 = arith.constant 0 : index
    %0 = vector.load %arg1[%c0, %c0_0] : memref<8x128xf32, #tpu.memory_space<vmem>>, vector<8x128xf32>
    %c0_1 = arith.constant 0 : index
    %c0_2 = arith.constant 0 : index
    %1 = vector.load %arg2[%c0_1, %c0_2] : memref<128x128xf32, #tpu.memory_space<vmem>>, vector<128x128xf32>
    %c0_3 = arith.constant 0 : index
    %c0_4 = arith.constant 0 : index
    %2 = vector.load %arg3[%c0_3, %c0_4] : memref<1x128xf32, #tpu.memory_space<vmem>>, vector<1x128xf32>
    %cst = arith.constant dense<0.000000e+00> : vector<8x128xf32>
    %3 = tpu.matmul %0, %1, %cst {dimension_numbers = #tpu.dot_dimension_numbers<[1], [0], [0], [1], [0, 0, 1, 1], [], []>} : vector<8x128xf32>, vector<128x128xf32>, vector<8x128xf32> -> vector<8x128xf32>
    %4 = vector.broadcast %2 : vector<1x128xf32> to vector<8x128xf32>
    %5 = arith.addf %3, %4 : vector<8x128xf32>
    %cst_5 = arith.constant 0.000000e+00 : f32
    %6 = vector.broadcast %cst_5 : f32 to vector<8x128xf32>
    %7 = arith.cmpf oge, %5, %6 : vector<8x128xf32>
    %cst_6 = arith.constant 0.00999999977 : f32
    %8 = vector.broadcast %cst_6 : f32 to vector<8x128xf32>
    %9 = arith.mulf %8, %5 : vector<8x128xf32>
    %10 = arith.select %7, %5, %9 : vector<8x128xi1>, vector<8x128xf32>
    %c0_7 = arith.constant 0 : index
    %c0_8 = arith.constant 0 : index
    %11 = vector.load %arg4[%c0_7, %c0_8] : memref<128x128xf32, #tpu.memory_space<vmem>>, vector<128x128xf32>
    %c0_9 = arith.constant 0 : index
    %c0_10 = arith.constant 0 : index
    %12 = vector.load %arg5[%c0_9, %c0_10] : memref<1x128xf32, #tpu.memory_space<vmem>>, vector<1x128xf32>
    %cst_11 = arith.constant dense<0.000000e+00> : vector<8x128xf32>
    %13 = tpu.matmul %10, %11, %cst_11 {dimension_numbers = #tpu.dot_dimension_numbers<[1], [0], [0], [1], [0, 0, 1, 1], [], []>} : vector<8x128xf32>, vector<128x128xf32>, vector<8x128xf32> -> vector<8x128xf32>
    %14 = vector.broadcast %12 : vector<1x128xf32> to vector<8x128xf32>
    %15 = arith.addf %13, %14 : vector<8x128xf32>
    %cst_12 = arith.constant 0.000000e+00 : f32
    %16 = vector.broadcast %cst_12 : f32 to vector<8x128xf32>
    %17 = arith.cmpf oge, %15, %16 : vector<8x128xf32>
    %cst_13 = arith.constant 0.00999999977 : f32
    %18 = vector.broadcast %cst_13 : f32 to vector<8x128xf32>
    %19 = arith.mulf %18, %15 : vector<8x128xf32>
    %20 = arith.select %17, %15, %19 : vector<8x128xi1>, vector<8x128xf32>
    %c0_14 = arith.constant 0 : index
    %c0_15 = arith.constant 0 : index
    %21 = vector.load %arg6[%c0_14, %c0_15] : memref<128x128xf32, #tpu.memory_space<vmem>>, vector<128x128xf32>
    %c0_16 = arith.constant 0 : index
    %c0_17 = arith.constant 0 : index
    %22 = vector.load %arg7[%c0_16, %c0_17] : memref<1x128xf32, #tpu.memory_space<vmem>>, vector<1x128xf32>
    %cst_18 = arith.constant dense<0.000000e+00> : vector<8x128xf32>
    %23 = tpu.matmul %20, %21, %cst_18 {dimension_numbers = #tpu.dot_dimension_numbers<[1], [0], [0], [1], [0, 0, 1, 1], [], []>} : vector<8x128xf32>, vector<128x128xf32>, vector<8x128xf32> -> vector<8x128xf32>
    %24 = vector.broadcast %22 : vector<1x128xf32> to vector<8x128xf32>
    %25 = arith.addf %23, %24 : vector<8x128xf32>
    %c0_19 = arith.constant 0 : index
    %c0_20 = arith.constant 0 : index
    %26 = vector.load %arg8[%c0_19, %c0_20] : memref<8x128xf32, #tpu.memory_space<vmem>>, vector<8x128xf32>
    tpu.vector_store %arg8[%c0_19, %c0_20], %25 {strides = array<i32>} : memref<8x128xf32, #tpu.memory_space<vmem>>, vector<8x128xf32>,
    return
  }
  func.func @transform_0(%arg0: i32) -> (i32, i32) {
    %c0_i32 = arith.constant 0 : i32
    %c0_i32_0 = arith.constant 0 : i32
    return %arg0, %c0_i32 : i32, i32
  }
  func.func @transform_1(%arg0: i32) -> (i32, i32) {
    %c0_i32 = arith.constant 0 : i32
    %c0_i32_0 = arith.constant 0 : i32
    %c0_i32_1 = arith.constant 0 : i32
    return %c0_i32, %c0_i32_0 : i32, i32
  }
  func.func @transform_2(%arg0: i32) -> (i32, i32) {
    %c0_i32 = arith.constant 0 : i32
    %c0_i32_0 = arith.constant 0 : i32
    %c0_i32_1 = arith.constant 0 : i32
    return %c0_i32, %c0_i32_0 : i32, i32
  }
  func.func @transform_3(%arg0: i32) -> (i32, i32) {
    %c0_i32 = arith.constant 0 : i32
    %c0_i32_0 = arith.constant 0 : i32
    %c0_i32_1 = arith.constant 0 : i32
    return %c0_i32, %c0_i32_0 : i32, i32
  }
  func.func @transform_4(%arg0: i32) -> (i32, i32) {
    %c0_i32 = arith.constant 0 : i32
    %c0_i32_0 = arith.constant 0 : i32
    %c0_i32_1 = arith.constant 0 : i32
    return %c0_i32, %c0_i32_0 : i32, i32
  }
  func.func @transform_5(%arg0: i32) -> (i32, i32) {
    %c0_i32 = arith.constant 0 : i32
    %c0_i32_0 = arith.constant 0 : i32
    %c0_i32_1 = arith.constant 0 : i32
    return %c0_i32, %c0_i32_0 : i32, i32
  }
  func.func @transform_6(%arg0: i32) -> (i32, i32) {
    %c0_i32 = arith.constant 0 : i32
    %c0_i32_0 = arith.constant 0 : i32
    %c0_i32_1 = arith.constant 0 : i32
    return %c0_i32, %c0_i32_0 : i32, i32
  }
  func.func @transform_7(%arg0: i32) -> (i32, i32) {
    %c0_i32 = arith.constant 0 : i32
    %c0_i32_0 = arith.constant 0 : i32
    return %arg0, %c0_i32 : i32, i32
  }
}

</mosaic_0001>

<bundles_post_ra>
// kernel: fwd.1
= control target key start
LH: loop header
LB: loop body
LE: loop exit
PB: predicated region body
PF: predicated region fallthrough
CT: control target
= control target key end

     0   :  { %12 = vsyncpa [#allocation3], 0  ;;  %s860_s0 = inlined_call_operand.vmem [shape: f32[8,128], index: 0, kind: input, shape index: {}]   ;;  %s861_s1 = inlined_call_operand.hbm [shape: f32[128,128], index: 1, kind: input, shape index: {}]   ;;  %s862_s2 = inlined_call_operand.vmem [shape: f32[1,128], index: 2, kind: input, shape index: {}]   ;;  %s863_s3 = inlined_call_operand.hbm [shape: f32[128,128], index: 3, kind: input, shape index: {}]   ;;  %s864_s4 = inlined_call_operand.vmem [shape: f32[1,128], index: 4, kind: input, shape index: {}]   ;;  %s865_s5 = inlined_call_operand.hbm [shape: f32[128,128], index: 5, kind: input, shape index: {}]   ;;  %s866_s6 = inlined_call_operand.vmem [shape: f32[1,128], index: 6, kind: input, shape index: {}]   ;;  %s867_s7 = inlined_call_operand.hbm [shape: f32[8,128], index: 7, kind: output, shape index: {}]  }
   0x1   :  { %13 = vsyncpa [#allocation6], 0 }
   0x2   :  { %14 = vsyncpa [#allocation4], 0  ;;  %s705_s24 = smov [#allocation5]   ;;  %s706_s26 = smov [#allocation2]  }
   0x3   :  { %s36_s25 = sshll.u32 %s705_s24, 4  ;;  %s22_s27 = sshll.u32 %s706_s26, 4  ;;  %s37_s25 = int_to_ptr.vmem [resolvable:$true] %s36_s25  ;;  %s754_s27 = int_to_ptr.vmem [resolvable:$true] %s22_s27 }
   0x4   :  { %s611_s30 = scalar_lea.hbm %s863_s3, 2048 }
   0x5   :  { %p612_p0 = scmp.ne.s32.totalorder %s863_s3, %s611_s30  ;;  %p615_p1 = scmp.lt.u32.totalorder %s611_s30, %s863_s3 }
   0x7   :  { %p617_p2 = pnand %p615_p1, %p612_p0 }
   0x9   :  { %620 = shalt.err (!%p617_p2)
}
   0xa   :  { %s621_s12 = scalar_lea.vmem %s37_s25, 2048  ;;  %p626_p4 = scmp.lt.s32.totalorder %s37_s25, %s37_s25 }
   0xb   :  { %p622_p3 = scmp.ne.s32.totalorder %s37_s25, %s621_s12  ;;  %p627_p5 = scmp.lt.s32.totalorder %s621_s12, %s621_s12 }
   0xd   :  { %p628_p6 = por %p627_p5, %p626_p4 }
   0xf   :  { %p629_p7 = pnand %p628_p6, %p622_p3 }
  0x11   :  { %632 = shalt.err (!%p629_p7)
}
  0x12   :  { %s707_s13 = smov 128   ;;  %s708_s14 = smov 8  }
  0x13   :  { %42 = dma.hbm_to_vmem [thread:$0]  %s863_s3, 2048, %s37_s25, [#allocation6], %s707_s13, %s707_s13, %s708_s14  }
  0x14   :  { %s633_s19 = scalar_lea.hbm %s861_s1, 2048 }
  0x15   :  { %p634_p8 = scmp.ne.s32.totalorder %s861_s1, %s633_s19  ;;  %p637_p9 = scmp.lt.u32.totalorder %s633_s19, %s861_s1 }
  0x17   :  { %p639_p10 = pnand %p637_p9, %p634_p8 }
  0x19   :  { %642 = shalt.err (!%p639_p10)
}
  0x1a   :  { %s643_s24 = scalar_lea.vmem %s754_s27, 2048  ;;  %p648_p12 = scmp.lt.s32.totalorder %s754_s27, %s754_s27 }
  0x1b   :  { %p644_p11 = scmp.ne.s32.totalorder %s754_s27, %s643_s24  ;;  %p649_p13 = scmp.lt.s32.totalorder %s643_s24, %s643_s24 }
  0x1d   :  { %p650_p0 = por %p649_p13, %p648_p12 }
  0x1f   :  { %p651_p1 = pnand %p650_p0, %p644_p11 }
  0x21   :  { %654 = shalt.err (!%p651_p1)
}
  0x22   :  { %28 = dma.hbm_to_vmem [thread:$0]  %s861_s1, 2048, %s754_s27, [#allocation3], %s707_s13, %s707_s13, %s708_s14  }
  0x23   :  { %s709_s26 = smov [#allocation7]   ;;  %s655_s8 = scalar_lea.hbm %s865_s5, 2048 }
  0x24   :  { %s50_s28 = sshll.u32 %s709_s26, 4  ;;  %p656_p2 = scmp.ne.s32.totalorder %s865_s5, %s655_s8  ;;  %s51_s28 = int_to_ptr.vmem [resolvable:$true] %s50_s28 }
  0x25   :  { %p659_p3 = scmp.lt.u32.totalorder %s655_s8, %s865_s5 }
  0x27   :  { %p661_p4 = pnand %p659_p3, %p656_p2 }
  0x29   :  { %664 = shalt.err (!%p661_p4)
}
  0x2a   :  { %s665_s15 = scalar_lea.vmem %s51_s28, 2048  ;;  %p670_p6 = scmp.lt.s32.totalorder %s51_s28, %s51_s28 }
  0x2b   :  { %p666_p5 = scmp.ne.s32.totalorder %s51_s28, %s665_s15  ;;  %p671_p7 = scmp.lt.s32.totalorder %s665_s15, %s665_s15 }
  0x2d   :  { %p672_p8 = por %p671_p7, %p670_p6 }
  0x2f   :  { %p673_p9 = pnand %p672_p8, %p666_p5 }
  0x31   :  { %676 = shalt.err (!%p673_p9)
}
  0x32   :  { %56 = dma.hbm_to_vmem [thread:$0]  %s865_s5, 2048, %s51_s28, [#allocation6], %s707_s13, %s707_s13, %s708_s14  }
  0x33   :  { %699 = dma.done.wait [#allocation3], 2048  }
  0x34   :  { %700 = vsyncadd [#allocation3], 4294965248 }
  0x35   :  { %701 = dma.done.wait [#allocation6], 4096  }
  0x36   :  { %702 = vsyncadd [#allocation6], 4294963200  ;;  %v710_v0 = vmov 0.0|0.0   ;;  %vm711_vm0 = vmmov 0   ;;  %v712_v1 = vmov 0.0   ;;  %v69_v2 = vld [vmem:[#allocation2] sm:$0xff] }
  0x37   :  { %530 = vmatprep.subr.bf16.mxu0 %v710_v0  ;;  %457 = vmatprep.mubr.msk.f32.mxu0 %vm711_vm0, %v712_v1  ;;  %v70_v3 = vld [vmem:[#allocation2 + $0x8] sm:$0xff]  ;;  %v71_v4 = vld [vmem:[#allocation2 + $0x10] sm:$0xff]  ;;  %v72_v6 = vld [vmem:[#allocation2 + $0x18] sm:$0xff]  ;;  %s713_s19 = smov [#allocation8]  }
  0x38   :  { %554 = vmatprep.subr.bf16.mxu1 %v710_v0  ;;  %492 = vmatprep.mubr.msk.f32.mxu1 %vm711_vm0, %v712_v1  ;;  %v531_v5 = vpack.c.bf16 %v70_v3, %v69_v2  ;;  %v534_v7 = vpack.c.bf16 %v72_v6, %v71_v4  ;;  %v73_v8 = vld [vmem:[#allocation2 + $0x20] sm:$0xff]  ;;  %v74_v9 = vld [vmem:[#allocation2 + $0x28] sm:$0xff]  ;;  %v167_v12 = vld [vmem:[#allocation5 + $0x10] sm:$0xff]  ;;  %s361_s20 = sshll.u32 %s713_s19, 4  ;;  %s362_s20 = int_to_ptr.vmem [resolvable:$true] %s361_s20 }
  0x39   :  { %v165_v10 = vld [vmem:[#allocation5] sm:$0xff]  ;;  %v166_v11 = vld [vmem:[#allocation5 + $0x8] sm:$0xff]  ;;  %v168_v13 = vld [vmem:[#allocation5 + $0x18] sm:$0xff]  ;;  %v537_v14 = vpack.c.bf16 %v74_v9, %v73_v8  ;;  %s677_s21 = scalar_lea.vmem %s362_s20, 128  ;;  %p682_p11 = scmp.lt.s32.totalorder %s362_s20, %s362_s20 }
  0x3a   :  { %532 = vmatpush3.bf16.msra.mxu0 %v531_v5  ;;  %v555_v15 = vpack.c.bf16 %v166_v11, %v165_v10  ;;  %v75_v16 = vld [vmem:[#allocation2 + $0x30] sm:$0xff]  ;;  %v76_v17 = vld [vmem:[#allocation2 + $0x38] sm:$0xff]  ;;  %v558_v18 = vpack.c.bf16 %v168_v13, %v167_v12  ;;  %v169_v19 = vld [vmem:[#allocation5 + $0x20] sm:$0xff]  ;;  %p678_p10 = scmp.ne.s32.totalorder %s362_s20, %s677_s21  ;;  %p683_p12 = scmp.lt.s32.totalorder %s677_s21, %s677_s21 }
  0x3b   :  { %533 = vmatprep.subr.bf16.mxu0 %v710_v0  ;;  %v170_v20 = vld [vmem:[#allocation5 + $0x28] sm:$0xff]  ;;  %v540_v21 = vpack.c.bf16 %v76_v17, %v75_v16  ;;  %v77_v22 = vld [vmem:[#allocation2 + $0x40] sm:$0xff]  ;;  %v171_v25 = vld [vmem:[#allocation5 + $0x30] sm:$0xff] }
  0x3c   :  { %556 = vmatpush3.bf16.msra.mxu1 %v555_v15  ;;  %v78_v23 = vld [vmem:[#allocation2 + $0x48] sm:$0xff]  ;;  %v561_v24 = vpack.c.bf16 %v170_v20, %v169_v19  ;;  %v172_v26 = vld [vmem:[#allocation5 + $0x38] sm:$0xff]  ;;  %v79_v28 = vld [vmem:[#allocation2 + $0x50] sm:$0xff]  ;;  %p684_p13 = por %p683_p12, %p682_p11 }
  0x3d   :  { %557 = vmatprep.subr.bf16.mxu1 %v710_v0  ;;  %v543_v27 = vpack.c.bf16 %v78_v23, %v77_v22  ;;  %v80_v29 = vld [vmem:[#allocation2 + $0x58] sm:$0xff]  ;;  %v564_v30 = vpack.c.bf16 %v172_v26, %v171_v25  ;;  %v173_v31 = vld [vmem:[#allocation5 + $0x40] sm:$0xff]  ;;  %v174_v32 = vld [vmem:[#allocation5 + $0x48] sm:$0xff] }
  0x3e   :  { %535 = vmatpush3.bf16.msra.mxu0 %v534_v7  ;;  %v546_v33 = vpack.c.bf16 %v80_v29, %v79_v28  ;;  %v81_v34 = vld [vmem:[#allocation2 + $0x60] sm:$0xff]  ;;  %v82_v35 = vld [vmem:[#allocation2 + $0x68] sm:$0xff]  ;;  %v567_v36 = vpack.c.bf16 %v174_v32, %v173_v31  ;;  %v175_v37 = vld [vmem:[#allocation5 + $0x50] sm:$0xff]  ;;  %p685_p0 = pnand %p684_p13, %p678_p10 }
  0x3f   :  { %536 = vmatprep.subr.bf16.mxu0 %v710_v0  ;;  %v176_v38 = vld [vmem:[#allocation5 + $0x58] sm:$0xff]  ;;  %v549_v39 = vpack.c.bf16 %v82_v35, %v81_v34  ;;  %v83_v40 = vld [vmem:[#allocation2 + $0x70] sm:$0xff]  ;;  %v177_v43 = vld [vmem:[#allocation5 + $0x60] sm:$0xff] }
  0x40   :  { %559 = vmatpush3.bf16.msra.mxu1 %v558_v18  ;;  %v84_v41 = vld [vmem:[#allocation2 + $0x78] sm:$0xff]  ;;  %v570_v42 = vpack.c.bf16 %v176_v38, %v175_v37  ;;  %v178_v44 = vld [vmem:[#allocation5 + $0x68] sm:$0xff]  ;;  %v68_v47 = vld [vmem:[%s860_s0] sm:$0xff] }
  0x41   :  { %560 = vmatprep.subr.bf16.mxu1 %v710_v0  ;;  %v552_v45 = vpack.c.bf16 %v84_v41, %v83_v40  ;;  %v573_v46 = vpack.c.bf16 %v178_v44, %v177_v43  ;;  %v179_v48 = vld [vmem:[#allocation5 + $0x70] sm:$0xff]  ;;  %v180_v49 = vld [vmem:[#allocation5 + $0x78] sm:$0xff]  ;;  %v261_v51 = vld [vmem:[#allocation7] sm:$0xff] }
  0x42   :  { %538 = vmatpush3.bf16.msra.mxu0 %v537_v14  ;;  %v576_v50 = vpack.c.bf16 %v180_v49, %v179_v48  ;;  %v262_v52 = vld [vmem:[#allocation7 + $0x8] sm:$0xff]  ;;  %v263_v53 = vld [vmem:[#allocation7 + $0x10] sm:$0xff]  ;;  %v264_v55 = vld [vmem:[#allocation7 + $0x18] sm:$0xff] }
  0x43   :  { %539 = vmatprep.subr.bf16.mxu0 %v710_v0  ;;  %v579_v54 = vpack.c.bf16 %v262_v52, %v261_v51  ;;  %v582_v56 = vpack.c.bf16 %v264_v55, %v263_v53  ;;  %v265_v57 = vld [vmem:[#allocation7 + $0x20] sm:$0xff]  ;;  %v266_v58 = vld [vmem:[#allocation7 + $0x28] sm:$0xff]  ;;  %v267_v60 = vld [vmem:[#allocation7 + $0x30] sm:$0xff] }
  0x44   :  { %562 = vmatpush3.bf16.msra.mxu1 %v561_v24  ;;  %v585_v59 = vpack.c.bf16 %v266_v58, %v265_v57  ;;  %v268_v61 = vld [vmem:[#allocation7 + $0x38] sm:$0xff]  ;;  %v269_v63 = vld [vmem:[#allocation7 + $0x40] sm:$0xff]  ;;  %v271_v3 = vld [vmem:[#allocation7 + $0x50] sm:$0xff] }
  0x45   :  { %563 = vmatprep.subr.bf16.mxu1 %v710_v0  ;;  %v588_v62 = vpack.c.bf16 %v268_v61, %v267_v60  ;;  %v272_v4 = vld [vmem:[#allocation7 + $0x58] sm:$0xff]  ;;  %v273_v6 = vld [vmem:[#allocation7 + $0x60] sm:$0xff]  ;;  %v274_v7 = vld [vmem:[#allocation7 + $0x68] sm:$0xff] }
  0x46   :  { %541 = vmatpush3.bf16.msra.mxu0 %v540_v21  ;;  %v594_v5 = vpack.c.bf16 %v272_v4, %v271_v3  ;;  %v597_v8 = vpack.c.bf16 %v274_v7, %v273_v6  ;;  %v371_v9 = vld [vmem:[%s862_s2] ss:$0 sm:$0xff]  ;;  %v275_v15 = vld [vmem:[#allocation7 + $0x70] sm:$0xff]  ;;  %v276_v16 = vld [vmem:[#allocation7 + $0x78] sm:$0xff] }
  0x47   :  { %542 = vmatprep.subr.bf16.mxu0 %v710_v0  ;;  %v600_v17 = vpack.c.bf16 %v276_v16, %v275_v15  ;;  %v372_v18 = vld [vmem:[%s864_s4] ss:$0 sm:$0xff] }
  0x48   :  { %565 = vmatpush3.bf16.msra.mxu1 %v564_v30  ;;  %v373_v23 = vld [vmem:[%s866_s6] ss:$0 sm:$0xff] }
  0x49   :  { %566 = vmatprep.subr.bf16.mxu1 %v710_v0 }
  0x4a   :  { %544 = vmatpush3.bf16.msra.mxu0 %v543_v27 }
  0x4b   :  { %545 = vmatprep.subr.bf16.mxu0 %v710_v0 }
  0x4c   :  { %568 = vmatpush3.bf16.msra.mxu1 %v567_v36 }
  0x4d   :  { %569 = vmatprep.subr.bf16.mxu1 %v710_v0 }
  0x4e   :  { %547 = vmatpush3.bf16.msra.mxu0 %v546_v33 }
  0x4f   :  { %548 = vmatprep.subr.bf16.mxu0 %v710_v0 }
  0x50   :  { %571 = vmatpush3.bf16.msra.mxu1 %v570_v42 }
  0x51   :  { %572 = vmatprep.subr.bf16.mxu1 %v710_v0 }
  0x52   :  { %550 = vmatpush3.bf16.msra.mxu0 %v549_v39 }
  0x53   :  { %551 = vmatprep.subr.bf16.mxu0 %v710_v0 }
  0x54   :  { %574 = vmatpush3.bf16.msra.mxu1 %v573_v46 }
  0x55   :  { %575 = vmatprep.subr.bf16.mxu1 %v710_v0 }
  0x56   :  { %553 = vmatpush3.bf16.msra.mxu0 %v552_v45 }
  0x57   :  { %578 = vmatprep.subr.bf16.mxu0 %v710_v0 }
  0x58   :  { %577 = vmatpush3.bf16.msra.mxu1 %v576_v50 }
  0x59   :  { %458 = vmatmul.mubr.f32.vlgmr.msra.gmra.mrb[0].mxu0 %v68_v47 }
  0x5a   :  { %527 = vmatprep.mubr.msk.f32.mxu0 %vm711_vm0, %v712_v1  ;;  %580 = vmatpush3.bf16.msra.mxu0 %v579_v54  ;;  %v270_v1 = vld [vmem:[#allocation7 + $0x48] sm:$0xff] }
  0x5b   :  { %581 = vmatprep.subr.bf16.mxu0 %v710_v0  ;;  %v591_v2 = vpack.c.bf16 %v270_v1, %v269_v63 }
  0x5e   :  { %583 = vmatpush3.bf16.msra.mxu0 %v582_v56 }
  0x5f   :  { %584 = vmatprep.subr.bf16.mxu0 %v710_v0 }
  0x62   :  { %586 = vmatpush3.bf16.msra.mxu0 %v585_v59 }
  0x63   :  { %587 = vmatprep.subr.bf16.mxu0 %v710_v0 }
  0x66   :  { %589 = vmatpush3.bf16.msra.mxu0 %v588_v62 }
  0x67   :  { %590 = vmatprep.subr.bf16.mxu0 %v710_v0 }
  0x6a   :  { %592 = vmatpush3.bf16.msra.mxu0 %v591_v2 }
  0x6b   :  { %593 = vmatprep.subr.bf16.mxu0 %v710_v0 }
  0x6e   :  { %595 = vmatpush3.bf16.msra.mxu0 %v594_v5 }
  0x6f   :  { %596 = vmatprep.subr.bf16.mxu0 %v710_v0 }
  0x72   :  { %598 = vmatpush3.bf16.msra.mxu0 %v597_v8 }
  0x73   :  { %599 = vmatprep.subr.bf16.mxu0 %v710_v0 }
  0x76   :  { %601 = vmatpush3.bf16.msra.mxu0 %v600_v17 }
 0x12c   :  { %v158_v10 = vpop.f32.mrb[0].mxu0 }
 0x12d   :  { %v159_v11 = vadd.f32 %v371_v9, %v158_v10  ;;  %v459_v12 = vpop.f32.mrb[1].mxu0 }
 0x12f   :  { %v163_v13 = vmul.f32 0.01, %v159_v11  ;;  %vm162_vm1 = vcmp.ge.f32.partialorder %v159_v11, 0.0 }
 0x131   :  { %v164_v14 = vsel %vm162_vm1, %v159_v11, %v163_v13 }
 0x132   :  { %493 = vmatmul.mubr.f32.vlgmr.msra.gmra.mrb[0].mxu1 %v164_v14 }
 0x205   :  { %v254_v0 = vpop.f32.mrb[0].mxu1 }
 0x206   :  { %v255_v19 = vadd.f32 %v372_v18, %v254_v0  ;;  %v494_v20 = vpop.f32.mrb[1].mxu1 }
 0x208   :  { %vm258_vm2 = vcmp.ge.f32.partialorder %v255_v19, 0.0  ;;  %v259_v21 = vmul.f32 0.01, %v255_v19 }
 0x20a   :  { %v260_v22 = vsel %vm258_vm2, %v255_v19, %v259_v21 }
 0x20b   :  { %528 = vmatmul.mubr.f32.vlgmr.msra.gmra.mrb[2].mxu0 %v260_v22 }
 0x2de   :  { %v350_v24 = vpop.f32.mrb[2].mxu0 }
 0x2df   :  { %v351_v25 = vadd.f32 %v373_v23, %v350_v24  ;;  %v529_v26 = vpop.f32.mrb[3].mxu0 }
 0x2e1   :  { %354 = vst [vmem:[#allocation8] sm:$0xff] %v351_v25 }
 0x2e2   :  { %688 = shalt.err (!%p685_p0)
}
 0x2e3   :  { %s689_s23 = scalar_lea.hbm %s867_s7, 128 }
 0x2e4   :  { %p690_p1 = scmp.ne.s32.totalorder %s867_s7, %s689_s23  ;;  %p693_p2 = scmp.lt.u32.totalorder %s689_s23, %s867_s7 }
 0x2e6   :  { %p695_p3 = pnand %p693_p2, %p690_p1 }
 0x2e8   :  { %698 = shalt.err (!%p695_p3)
}
 0x2e9   :  { %364 = dma.vmem_to_hbm [thread:$0]  %s362_s20, 128, %s867_s7, [#allocation4]  }
 0x2ea   :  { %703 = dma.done.wait [#allocation4], 128  }
 0x2eb   :  { %704 = vsyncadd [#allocation4], 4294967168 }
 0x2ec   :  { %368 = vsyncpa [#allocation3], 1 }
 0x2ed   :  { %369 = vsyncpa [#allocation6], 1 }
 0x2ee   :  { %370 = vsyncpa [#allocation4], 1 }

// kernel: fwd.1
= control target key start
LH: loop header
LB: loop body
LE: loop exit
PB: predicated region body
PF: predicated region fallthrough
CT: control target
= control target key end

     0   :  { %12 = vsyncpa [#allocation3], 0  ;;  %s860_s0 = inlined_call_operand.vmem [shape: f32[8,128], index: 0, kind: input, shape index: {}]   ;;  %s861_s1 = inlined_call_operand.hbm [shape: f32[128,128], index: 1, kind: input, shape index: {}]   ;;  %s862_s2 = inlined_call_operand.vmem [shape: f32[1,128], index: 2, kind: input, shape index: {}]   ;;  %s863_s3 = inlined_call_operand.hbm [shape: f32[128,128], index: 3, kind: input, shape index: {}]   ;;  %s864_s4 = inlined_call_operand.vmem [shape: f32[1,128], index: 4, kind: input, shape index: {}]   ;;  %s865_s5 = inlined_call_operand.hbm [shape: f32[128,128], index: 5, kind: input, shape index: {}]   ;;  %s866_s6 = inlined_call_operand.vmem [shape: f32[1,128], index: 6, kind: input, shape index: {}]   ;;  %s867_s7 = inlined_call_operand.hbm [shape: f32[8,128], index: 7, kind: output, shape index: {}]  }
   0x1   :  { %13 = vsyncpa [#allocation6], 0 }
   0x2   :  { %14 = vsyncpa [#allocation4], 0  ;;  %s705_s24 = smov [#allocation5]   ;;  %s706_s26 = smov [#allocation2]  }
   0x3   :  { %s36_s25 = sshll.u32 %s705_s24, 4  ;;  %s22_s27 = sshll.u32 %s706_s26, 4  ;;  %s37_s25 = int_to_ptr.vmem [resolvable:$true] %s36_s25  ;;  %s754_s27 = int_to_ptr.vmem [resolvable:$true] %s22_s27 }
   0x4   :  { %s611_s30 = scalar_lea.hbm %s863_s3, 2048 }
   0x5   :  { %p612_p0 = scmp.ne.s32.totalorder %s863_s3, %s611_s30  ;;  %p615_p1 = scmp.lt.u32.totalorder %s611_s30, %s863_s3 }
   0x7   :  { %p617_p2 = pnand %p615_p1, %p612_p0 }
   0x9   :  { %620 = shalt.err (!%p617_p2)
}
   0xa   :  { %s621_s12 = scalar_lea.vmem %s37_s25, 2048  ;;  %p626_p4 = scmp.lt.s32.totalorder %s37_s25, %s37_s25 }
   0xb   :  { %p622_p3 = scmp.ne.s32.totalorder %s37_s25, %s621_s12  ;;  %p627_p5 = scmp.lt.s32.totalorder %s621_s12, %s621_s12 }
   0xd   :  { %p628_p6 = por %p627_p5, %p626_p4 }
   0xf   :  { %p629_p7 = pnand %p628_p6, %p622_p3 }
  0x11   :  { %632 = shalt.err (!%p629_p7)
}
  0x12   :  { %s707_s13 = smov 128   ;;  %s708_s14 = smov 8  }
  0x13   :  { %42 = dma.hbm_to_vmem [thread:$0]  %s863_s3, 2048, %s37_s25, [#allocation6], %s707_s13, %s707_s13, %s708_s14  }
  0x14   :  { %s633_s19 = scalar_lea.hbm %s861_s1, 2048 }
  0x15   :  { %p634_p8 = scmp.ne.s32.totalorder %s861_s1, %s633_s19  ;;  %p637_p9 = scmp.lt.u32.totalorder %s633_s19, %s861_s1 }
  0x17   :  { %p639_p10 = pnand %p637_p9, %p634_p8 }
  0x19   :  { %642 = shalt.err (!%p639_p10)
}
  0x1a   :  { %s643_s24 = scalar_lea.vmem %s754_s27, 2048  ;;  %p648_p12 = scmp.lt.s32.totalorder %s754_s27, %s754_s27 }
  0x1b   :  { %p644_p11 = scmp.ne.s32.totalorder %s754_s27, %s643_s24  ;;  %p649_p13 = scmp.lt.s32.totalorder %s643_s24, %s643_s24 }
  0x1d   :  { %p650_p0 = por %p649_p13, %p648_p12 }
  0x1f   :  { %p651_p1 = pnand %p650_p0, %p644_p11 }
  0x21   :  { %654 = shalt.err (!%p651_p1)
}
  0x22   :  { %28 = dma.hbm_to_vmem [thread:$0]  %s861_s1, 2048, %s754_s27, [#allocation3], %s707_s13, %s707_s13, %s708_s14  }
  0x23   :  { %s709_s26 = smov [#allocation7]   ;;  %s655_s8 = scalar_lea.hbm %s865_s5, 2048 }
  0x24   :  { %s50_s28 = sshll.u32 %s709_s26, 4  ;;  %p656_p2 = scmp.ne.s32.totalorder %s865_s5, %s655_s8  ;;  %s51_s28 = int_to_ptr.vmem [resolvable:$true] %s50_s28 }
  0x25   :  { %p659_p3 = scmp.lt.u32.totalorder %s655_s8, %s865_s5 }
  0x27   :  { %p661_p4 = pnand %p659_p3, %p656_p2 }
  0x29   :  { %664 = shalt.err (!%p661_p4)
}
  0x2a   :  { %s665_s15 = scalar_lea.vmem %s51_s28, 2048  ;;  %p670_p6 = scmp.lt.s32.totalorder %s51_s28, %s51_s28 }
  0x2b   :  { %p666_p5 = scmp.ne.s32.totalorder %s51_s28, %s665_s15  ;;  %p671_p7 = scmp.lt.s32.totalorder %s665_s15, %s665_s15 }
  0x2d   :  { %p672_p8 = por %p671_p7, %p670_p6 }
  0x2f   :  { %p673_p9 = pnand %p672_p8, %p666_p5 }
  0x31   :  { %676 = shalt.err (!%p673_p9)
}
  0x32   :  { %56 = dma.hbm_to_vmem [thread:$0]  %s865_s5, 2048, %s51_s28, [#allocation6], %s707_s13, %s707_s13, %s708_s14  }
  0x33   :  { %699 = dma.done.wait [#allocation3], 2048  }
  0x34   :  { %700 = vsyncadd [#allocation3], 4294965248 }
  0x35   :  { %701 = dma.done.wait [#allocation6], 4096  }
  0x36   :  { %702 = vsyncadd [#allocation6], 4294963200  ;;  %v710_v0 = vmov 0.0|0.0   ;;  %vm711_vm0 = vmmov 0   ;;  %v712_v1 = vmov 0.0   ;;  %v69_v2 = vld [vmem:[#allocation2] sm:$0xff] }
  0x37   :  { %530 = vmatprep.subr.bf16.mxu0 %v710_v0  ;;  %457 = vmatprep.mubr.msk.f32.mxu0 %vm711_vm0, %v712_v1  ;;  %v70_v3 = vld [vmem:[#allocation2 + $0x8] sm:$0xff]  ;;  %v71_v4 = vld [vmem:[#allocation2 + $0x10] sm:$0xff]  ;;  %v72_v6 = vld [vmem:[#allocation2 + $0x18] sm:$0xff]  ;;  %s713_s19 = smov [#allocation8]  }
  0x38   :  { %554 = vmatprep.subr.bf16.mxu1 %v710_v0  ;;  %492 = vmatprep.mubr.msk.f32.mxu1 %vm711_vm0, %v712_v1  ;;  %v531_v5 = vpack.c.bf16 %v70_v3, %v69_v2  ;;  %v534_v7 = vpack.c.bf16 %v72_v6, %v71_v4  ;;  %v73_v8 = vld [vmem:[#allocation2 + $0x20] sm:$0xff]  ;;  %v74_v9 = vld [vmem:[#allocation2 + $0x28] sm:$0xff]  ;;  %v167_v12 = vld [vmem:[#allocation5 + $0x10] sm:$0xff]  ;;  %s361_s20 = sshll.u32 %s713_s19, 4  ;;  %s362_s20 = int_to_ptr.vmem [resolvable:$true] %s361_s20 }
  0x39   :  { %v165_v10 = vld [vmem:[#allocation5] sm:$0xff]  ;;  %v166_v11 = vld [vmem:[#allocation5 + $0x8] sm:$0xff]  ;;  %v168_v13 = vld [vmem:[#allocation5 + $0x18] sm:$0xff]  ;;  %v537_v14 = vpack.c.bf16 %v74_v9, %v73_v8  ;;  %s677_s21 = scalar_lea.vmem %s362_s20, 128  ;;  %p682_p11 = scmp.lt.s32.totalorder %s362_s20, %s362_s20 }
  0x3a   :  { %532 = vmatpush3.bf16.msra.mxu0 %v531_v5  ;;  %v555_v15 = vpack.c.bf16 %v166_v11, %v165_v10  ;;  %v75_v16 = vld [vmem:[#allocation2 + $0x30] sm:$0xff]  ;;  %v76_v17 = vld [vmem:[#allocation2 + $0x38] sm:$0xff]  ;;  %v558_v18 = vpack.c.bf16 %v168_v13, %v167_v12  ;;  %v169_v19 = vld [vmem:[#allocation5 + $0x20] sm:$0xff]  ;;  %p678_p10 = scmp.ne.s32.totalorder %s362_s20, %s677_s21  ;;  %p683_p12 = scmp.lt.s32.totalorder %s677_s21, %s677_s21 }
  0x3b   :  { %533 = vmatprep.subr.bf16.mxu0 %v710_v0  ;;  %v170_v20 = vld [vmem:[#allocation5 + $0x28] sm:$0xff]  ;;  %v540_v21 = vpack.c.bf16 %v76_v17, %v75_v16  ;;  %v77_v22 = vld [vmem:[#allocation2 + $0x40] sm:$0xff]  ;;  %v171_v25 = vld [vmem:[#allocation5 + $0x30] sm:$0xff] }
  0x3c   :  { %556 = vmatpush3.bf16.msra.mxu1 %v555_v15  ;;  %v78_v23 = vld [vmem:[#allocation2 + $0x48] sm:$0xff]  ;;  %v561_v24 = vpack.c.bf16 %v170_v20, %v169_v19  ;;  %v172_v26 = vld [vmem:[#allocation5 + $0x38] sm:$0xff]  ;;  %v79_v28 = vld [vmem:[#allocation2 + $0x50] sm:$0xff]  ;;  %p684_p13 = por %p683_p12, %p682_p11 }
  0x3d   :  { %557 = vmatprep.subr.bf16.mxu1 %v710_v0  ;;  %v543_v27 = vpack.c.bf16 %v78_v23, %v77_v22  ;;  %v80_v29 = vld [vmem:[#allocation2 + $0x58] sm:$0xff]  ;;  %v564_v30 = vpack.c.bf16 %v172_v26, %v171_v25  ;;  %v173_v31 = vld [vmem:[#allocation5 + $0x40] sm:$0xff]  ;;  %v174_v32 = vld [vmem:[#allocation5 + $0x48] sm:$0xff] }
  0x3e   :  { %535 = vmatpush3.bf16.msra.mxu0 %v534_v7  ;;  %v546_v33 = vpack.c.bf16 %v80_v29, %v79_v28  ;;  %v81_v34 = vld [vmem:[#allocation2 + $0x60] sm:$0xff]  ;;  %v82_v35 = vld [vmem:[#allocation2 + $0x68] sm:$0xff]  ;;  %v567_v36 = vpack.c.bf16 %v174_v32, %v173_v31  ;;  %v175_v37 = vld [vmem:[#allocation5 + $0x50] sm:$0xff]  ;;  %p685_p0 = pnand %p684_p13, %p678_p10 }
  0x3f   :  { %536 = vmatprep.subr.bf16.mxu0 %v710_v0  ;;  %v176_v38 = vld [vmem:[#allocation5 + $0x58] sm:$0xff]  ;;  %v549_v39 = vpack.c.bf16 %v82_v35, %v81_v34  ;;  %v83_v40 = vld [vmem:[#allocation2 + $0x70] sm:$0xff]  ;;  %v177_v43 = vld [vmem:[#allocation5 + $0x60] sm:$0xff] }
  0x40   :  { %559 = vmatpush3.bf16.msra.mxu1 %v558_v18  ;;  %v84_v41 = vld [vmem:[#allocation2 + $0x78] sm:$0xff]  ;;  %v570_v42 = vpack.c.bf16 %v176_v38, %v175_v37  ;;  %v178_v44 = vld [vmem:[#allocation5 + $0x68] sm:$0xff]  ;;  %v68_v47 = vld [vmem:[%s860_s0] sm:$0xff] }
  0x41   :  { %560 = vmatprep.subr.bf16.mxu1 %v710_v0  ;;  %v552_v45 = vpack.c.bf16 %v84_v41, %v83_v40  ;;  %v573_v46 = vpack.c.bf16 %v178_v44, %v177_v43  ;;  %v179_v48 = vld [vmem:[#allocation5 + $0x70] sm:$0xff]  ;;  %v180_v49 = vld [vmem:[#allocation5 + $0x78] sm:$0xff]  ;;  %v261_v51 = vld [vmem:[#allocation7] sm:$0xff] }
  0x42   :  { %538 = vmatpush3.bf16.msra.mxu0 %v537_v14  ;;  %v576_v50 = vpack.c.bf16 %v180_v49, %v179_v48  ;;  %v262_v52 = vld [vmem:[#allocation7 + $0x8] sm:$0xff]  ;;  %v263_v53 = vld [vmem:[#allocation7 + $0x10] sm:$0xff]  ;;  %v264_v55 = vld [vmem:[#allocation7 + $0x18] sm:$0xff] }
  0x43   :  { %539 = vmatprep.subr.bf16.mxu0 %v710_v0  ;;  %v579_v54 = vpack.c.bf16 %v262_v52, %v261_v51  ;;  %v582_v56 = vpack.c.bf16 %v264_v55, %v263_v53  ;;  %v265_v57 = vld [vmem:[#allocation7 + $0x20] sm:$0xff]  ;;  %v266_v58 = vld [vmem:[#allocation7 + $0x28] sm:$0xff]  ;;  %v267_v60 = vld [vmem:[#allocation7 + $0x30] sm:$0xff] }
  0x44   :  { %562 = vmatpush3.bf16.msra.mxu1 %v561_v24  ;;  %v585_v59 = vpack.c.bf16 %v266_v58, %v265_v57  ;;  %v268_v61 = vld [vmem:[#allocation7 + $0x38] sm:$0xff]  ;;  %v269_v63 = vld [vmem:[#allocation7 + $0x40] sm:$0xff]  ;;  %v271_v3 = vld [vmem:[#allocation7 + $0x50] sm:$0xff] }
  0x45   :  { %563 = vmatprep.subr.bf16.mxu1 %v710_v0  ;;  %v588_v62 = vpack.c.bf16 %v268_v61, %v267_v60  ;;  %v272_v4 = vld [vmem:[#allocation7 + $0x58] sm:$0xff]  ;;  %v273_v6 = vld [vmem:[#allocation7 + $0x60] sm:$0xff]  ;;  %v274_v7 = vld [vmem:[#allocation7 + $0x68] sm:$0xff] }
  0x46   :  { %541 = vmatpush3.bf16.msra.mxu0 %v540_v21  ;;  %v594_v5 = vpack.c.bf16 %v272_v4, %v271_v3  ;;  %v597_v8 = vpack.c.bf16 %v274_v7, %v273_v6  ;;  %v371_v9 = vld [vmem:[%s862_s2] ss:$0 sm:$0xff]  ;;  %v275_v15 = vld [vmem:[#allocation7 + $0x70] sm:$0xff]  ;;  %v276_v16 = vld [vmem:[#allocation7 + $0x78] sm:$0xff] }
  0x47   :  { %542 = vmatprep.subr.bf16.mxu0 %v710_v0  ;;  %v600_v17 = vpack.c.bf16 %v276_v16, %v275_v15  ;;  %v372_v18 = vld [vmem:[%s864_s4] ss:$0 sm:$0xff] }
  0x48   :  { %565 = vmatpush3.bf16.msra.mxu1 %v564_v30  ;;  %v373_v23 = vld [vmem:[%s866_s6] ss:$0 sm:$0xff] }
  0x49   :  { %566 = vmatprep.subr.bf16.mxu1 %v710_v0 }
  0x4a   :  { %544 = vmatpush3.bf16.msra.mxu0 %v543_v27 }
  0x4b   :  { %545 = vmatprep.subr.bf16.mxu0 %v710_v0 }
  0x4c   :  { %568 = vmatpush3.bf16.msra.mxu1 %v567_v36 }
  0x4d   :  { %569 = vmatprep.subr.bf16.mxu1 %v710_v0 }
  0x4e   :  { %547 = vmatpush3.bf16.msra.mxu0 %v546_v33 }
  0x4f   :  { %548 = vmatprep.subr.bf16.mxu0 %v710_v0 }
  0x50   :  { %571 = vmatpush3.bf16.msra.mxu1 %v570_v42 }
  0x51   :  { %572 = vmatprep.subr.bf16.mxu1 %v710_v0 }
  0x52   :  { %550 = vmatpush3.bf16.msra.mxu0 %v549_v39 }
  0x53   :  { %551 = vmatprep.subr.bf16.mxu0 %v710_v0 }
  0x54   :  { %574 = vmatpush3.bf16.msra.mxu1 %v573_v46 }
  0x55   :  { %575 = vmatprep.subr.bf16.mxu1 %v710_v0 }
  0x56   :  { %553 = vmatpush3.bf16.msra.mxu0 %v552_v45 }
  0x57   :  { %578 = vmatprep.subr.bf16.mxu0 %v710_v0 }
  0x58   :  { %577 = vmatpush3.bf16.msra.mxu1 %v576_v50 }
  0x59   :  { %458 = vmatmul.mubr.f32.vlgmr.msra.gmra.mrb[0].mxu0 %v68_v47 }
  0x5a   :  { %527 = vmatprep.mubr.msk.f32.mxu0 %vm711_vm0, %v712_v1  ;;  %580 = vmatpush3.bf16.msra.mxu0 %v579_v54  ;;  %v270_v1 = vld [vmem:[#allocation7 + $0x48] sm:$0xff] }
  0x5b   :  { %581 = vmatprep.subr.bf16.mxu0 %v710_v0  ;;  %v591_v2 = vpack.c.bf16 %v270_v1, %v269_v63 }
  0x5e   :  { %583 = vmatpush3.bf16.msra.mxu0 %v582_v56 }
  0x5f   :  { %584 = vmatprep.subr.bf16.mxu0 %v710_v0 }
  0x62   :  { %586 = vmatpush3.bf16.msra.mxu0 %v585_v59 }
  0x63   :  { %587 = vmatprep.subr.bf16.mxu0 %v710_v0 }
  0x66   :  { %589 = vmatpush3.bf16.msra.mxu0 %v588_v62 }
  0x67   :  { %590 = vmatprep.subr.bf16.mxu0 %v710_v0 }
  0x6a   :  { %592 = vmatpush3.bf16.msra.mxu0 %v591_v2 }
  0x6b   :  { %593 = vmatprep.subr.bf16.mxu0 %v710_v0 }
  0x6e   :  { %595 = vmatpush3.bf16.msra.mxu0 %v594_v5 }
  0x6f   :  { %596 = vmatprep.subr.bf16.mxu0 %v710_v0 }
  0x72   :  { %598 = vmatpush3.bf16.msra.mxu0 %v597_v8 }
  0x73   :  { %599 = vmatprep.subr.bf16.mxu0 %v710_v0 }
  0x76   :  { %601 = vmatpush3.bf16.msra.mxu0 %v600_v17 }
 0x12c   :  { %v158_v10 = vpop.f32.mrb[0].mxu0 }
 0x12d   :  { %v159_v11 = vadd.f32 %v371_v9, %v158_v10  ;;  %v459_v12 = vpop.f32.mrb[1].mxu0 }
 0x12f   :  { %v163_v13 = vmul.f32 0.01, %v159_v11  ;;  %vm162_vm1 = vcmp.ge.f32.partialorder %v159_v11, 0.0 }
 0x131   :  { %v164_v14 = vsel %vm162_vm1, %v159_v11, %v163_v13 }
 0x132   :  { %493 = vmatmul.mubr.f32.vlgmr.msra.gmra.mrb[0].mxu1 %v164_v14 }
 0x205   :  { %v254_v0 = vpop.f32.mrb[0].mxu1 }
 0x206   :  { %v255_v19 = vadd.f32 %v372_v18, %v254_v0  ;;  %v494_v20 = vpop.f32.mrb[1].mxu1 }
 0x208   :  { %vm258_vm2 = vcmp.ge.f32.partialorder %v255_v19, 0.0  ;;  %v259_v21 = vmul.f32 0.01, %v255_v19 }
 0x20a   :  { %v260_v22 = vsel %vm258_vm2, %v255_v19, %v259_v21 }
 0x20b   :  { %528 = vmatmul.mubr.f32.vlgmr.msra.gmra.mrb[2].mxu0 %v260_v22 }
 0x2de   :  { %v350_v24 = vpop.f32.mrb[2].mxu0 }
 0x2df   :  { %v351_v25 = vadd.f32 %v373_v23, %v350_v24  ;;  %v529_v26 = vpop.f32.mrb[3].mxu0 }
 0x2e1   :  { %354 = vst [vmem:[#allocation8] sm:$0xff] %v351_v25 }
 0x2e2   :  { %688 = shalt.err (!%p685_p0)
}
 0x2e3   :  { %s689_s23 = scalar_lea.hbm %s867_s7, 128 }
 0x2e4   :  { %p690_p1 = scmp.ne.s32.totalorder %s867_s7, %s689_s23  ;;  %p693_p2 = scmp.lt.u32.totalorder %s689_s23, %s867_s7 }
 0x2e6   :  { %p695_p3 = pnand %p693_p2, %p690_p1 }
 0x2e8   :  { %698 = shalt.err (!%p695_p3)
}
 0x2e9   :  { %364 = dma.vmem_to_hbm [thread:$0]  %s362_s20, 128, %s867_s7, [#allocation4]  }
 0x2ea   :  { %703 = dma.done.wait [#allocation4], 128  }
 0x2eb   :  { %704 = vsyncadd [#allocation4], 4294967168 }
 0x2ec   :  { %368 = vsyncpa [#allocation3], 1 }
 0x2ed   :  { %369 = vsyncpa [#allocation6], 1 }
 0x2ee   :  { %370 = vsyncpa [#allocation4], 1 }

</bundles_post_ra>
